<compile_context>
chip_gen: v5e
topology: v5e:2x2
jax: 0.10.0
libtpu: 0.0.40
codegen_flags: <defaults>
</compile_context>

<pallas_src>
import functools
import math

import jax
import jax.numpy as jnp
from jax.experimental import pallas as pl
from jax.experimental.pallas import tpu as pltpu


def _round_up(x: int, m: int) -> int:
    return ((x + m - 1) // m) * m


def _gather_embed_kernel(ids_ref, tab_hbm, out_ref, buf, sem, *, tile_t, scale):
    """Gather one token tile of embedding rows via manual row DMAs, then scale.

    ids_ref : SMEM (n_tok_p,) int32   -- all token ids (scalar prefetch).
    tab_hbm : ANY  (vocab, d_model)   -- embedding table, left in HBM.
    out_ref : VMEM (tile_t, d_model)  -- output tile (auto-pipelined writeback).
    buf     : VMEM (tile_t, d_model)  -- gather landing buffer (table dtype).
    sem     : DMA semaphore shared by all row copies (equal-size copies, so
              tile_t starts followed by tile_t waits guarantees completion).
    """
    base = pl.program_id(0) * tile_t

    # Issue all row-gather DMAs up front so they overlap each other (and the
    # auto-pipelined writeback of the previous output tile).
    @pl.loop(0, tile_t)
    def _(i):
        row = ids_ref[base + i]
        pltpu.make_async_copy(tab_hbm.at[row], buf.at[i], sem).start()

    # Wait for all of them (the src index in the wait descriptor only fixes
    # the transfer size; all row copies are the same size).
    @pl.loop(0, tile_t)
    def _(i):
        pltpu.make_async_copy(tab_hbm.at[0], buf.at[i], sem).wait()

    out_ref[...] = (buf[...].astype(jnp.float32) * scale).astype(out_ref.dtype)


def input_embeddings(ids, emb_table, d_model, *, tile_t=256, out_dtype=None,
                     vmem_budget=40 * 1024 * 1024):
    """ids: (batch, seq) int; emb_table: (vocab, d_model) -> (batch, seq, d_model).

    Equivalent to PyTorch: nn.Embedding(vocab, d_model)(ids) * sqrt(d_model).
    """
    batch, seq = ids.shape
    vocab, dm = emb_table.shape
    assert dm == d_model
    out_dtype = emb_table.dtype if out_dtype is None else jnp.dtype(out_dtype)
    n_tok = batch * seq
    scale = float(math.sqrt(d_model))

    # Sublane-aligned token tile, clipped to the problem size.
    tile_t = max(8, min(int(tile_t), _round_up(n_tok, 8)))
    tile_t = _round_up(tile_t, 8)

    tab_bytes = jnp.dtype(emb_table.dtype).itemsize
    out_bytes = jnp.dtype(out_dtype).itemsize

    def vmem_need(tt):
        # gather buffer + double-buffered output block
        return tt * d_model * tab_bytes + 2 * tt * d_model * out_bytes

    # Shrink tile_t until the VMEM working set fits the (v7x-safe) budget.
    while tile_t > 8 and vmem_need(tile_t) > vmem_budget:
        tile_t = max(8, _round_up(tile_t // 2, 8))

    n_tok_p = _round_up(n_tok, tile_t)

    ids_flat = ids.reshape(n_tok).astype(jnp.int32)
    # Clamp so a bad id can never cause an OOB DMA (PyTorch would raise here).
    ids_flat = jnp.clip(ids_flat, 0, vocab - 1)
    if n_tok_p != n_tok:
        # Pad tokens gather row 0; sliced off below.
        ids_flat = jnp.pad(ids_flat, (0, n_tok_p - n_tok))

    grid = (n_tok_p // tile_t,)

    vmem_limit = int(min(max(vmem_need(tile_t) + (8 << 20), 16 << 20), 100 << 20))

    out_flat = pl.pallas_call(
        functools.partial(_gather_embed_kernel, tile_t=tile_t, scale=scale),
        grid_spec=pltpu.PrefetchScalarGridSpec(
            num_scalar_prefetch=1,          # ids -> SMEM
            grid=grid,
            in_specs=[
                # Embedding table stays in HBM; rows are gathered manually.
                pl.BlockSpec(memory_space=pl.ANY),
            ],
            out_specs=pl.BlockSpec((tile_t, d_model), lambda t, ids: (t, 0)),
            scratch_shapes=[
                pltpu.VMEM((tile_t, d_model), emb_table.dtype),
                pltpu.SemaphoreType.DMA,
            ],
        ),
        out_shape=jax.ShapeDtypeStruct((n_tok_p, d_model), out_dtype),
        compiler_params=pltpu.CompilerParams(
            # Token tiles are independent -> shards across both TCs on v7x;
            # each core now moves only its half of the gathered bytes.
            dimension_semantics=("parallel",),
            vmem_limit_bytes=vmem_limit,
        ),
    )(ids_flat, emb_table)

    return out_flat[:n_tok].reshape(batch, seq, d_model)


if __name__ == "__main__":
    d_model = 32
    vocab_size = 64
    batch, seq = 2, 8

    key = jax.random.PRNGKey(0)
    k_emb, k_ids = jax.random.split(key)

    # Deterministic parameter init (nn.Embedding default: N(0, 1)), f32 weights.
    emb_table = jax.random.normal(k_emb, (vocab_size, d_model), dtype=jnp.float32)
    ids = jax.random.randint(k_ids, (batch, seq), 0, vocab_size, dtype=jnp.int32)

    # Reference: plain JAX gather + scale (PyTorch semantics).
    ref = emb_table[ids] * math.sqrt(d_model)

    # Single token tile (grid=(1,)).
    out = input_embeddings(ids, emb_table, d_model)
    out = jax.block_until_ready(out)
    assert out.shape == (batch, seq, d_model)
    assert jnp.allclose(out, ref), "mismatch vs reference (single tile)"

    # Multiple token tiles (tile_t=8 -> grid=(2,)) to exercise tiled indexing.
    out_tiled = input_embeddings(ids, emb_table, d_model, tile_t=8)
    out_tiled = jax.block_until_ready(out_tiled)
    assert jnp.allclose(out_tiled, ref), "mismatch vs reference (tiled)"

    print("KERNEL_OK")
</pallas_src>

<mosaic_0001>
module attributes {stable_mosaic.version = 11 : i64} {
  func.func @_gather_embed_kernel(%arg0: i32, %arg1: memref<16xi32, #tpu.memory_space<smem>>, %arg2: memref<64x32xf32, #tpu.memory_space<any>>, %arg3: memref<16x32xf32, #tpu.memory_space<vmem>>, %arg4: memref<16x32xf32, #tpu.memory_space<vmem>>, %arg5: memref<!tpu.dma_semaphore, #tpu.memory_space<semaphore_mem>>) attributes {dimension_semantics = [#tpu.dimension_semantics<parallel>], iteration_bounds = array<i64: 1>, scalar_prefetch = 1 : i64, scratch_operands = 2 : i64, tpu.core_type = #tpu.core_type<tc>, window_params = [{}, {transform_indices = @transform_1, window_bounds = array<i64: 16, 32>}]} {
    %c16_i32 = arith.constant 16 : i32
    %0 = arith.muli %arg0, %c16_i32 : i32
    %c0_i32 = arith.constant 0 : i32
    %c16_i32_0 = arith.constant 16 : i32
    %1 = arith.addi %c0_i32, %c16_i32_0 : i32
    %c1_i32 = arith.constant 1 : i32
    scf.for %arg6 = %c0_i32 to %1 step %c1_i32  : i32 {
      %c1_i32_9 = arith.constant 1 : i32
      %7 = arith.muli %arg6, %c1_i32_9 : i32
      %c0_i32_10 = arith.constant 0 : i32
      %8 = arith.addi %c0_i32_10, %7 : i32
      %9 = arith.addi %0, %8 : i32
      %10 = arith.index_cast %9 : i32 to index
      %11 = memref.load %arg1[%10] : memref<16xi32, #tpu.memory_space<smem>>
      %c0_i32_11 = arith.constant 0 : i32
      %12 = tpu.memref_slice %arg2[%11, %c0_i32_11] : memref<64x32xf32, #tpu.memory_space<any>> -> memref<1x32xf32, #tpu.memory_space<any>>
      %13 = tpu.memref_squeeze %12 : memref<1x32xf32, #tpu.memory_space<any>> -> memref<32xf32, #tpu.memory_space<any>>
      %c0_i32_12 = arith.constant 0 : i32
      %14 = tpu.memref_slice %arg4[%8, %c0_i32_12] : memref<16x32xf32, #tpu.memory_space<vmem>> -> memref<1x32xf32, #tpu.memory_space<vmem>>
      %15 = tpu.memref_squeeze %14 : memref<1x32xf32, #tpu.memory_space<vmem>> -> memref<32xf32, #tpu.memory_space<vmem>>
      tpu.enqueue_dma source(%13 : memref<32xf32, #tpu.memory_space<any>>) target(%15 : memref<32xf32, #tpu.memory_space<vmem>>) target_semaphore(%arg5 : memref<!tpu.dma_semaphore, #tpu.memory_space<semaphore_mem>>)
    }
    %c16_i32_1 = arith.constant 16 : i32
    %c0_i32_2 = arith.constant 0 : i32
    %c16_i32_3 = arith.constant 16 : i32
    %2 = arith.addi %c0_i32_2, %c16_i32_3 : i32
    %c1_i32_4 = arith.constant 1 : i32
    scf.for %arg6 = %c0_i32_2 to %2 step %c1_i32_4  : i32 {
      %c1_i32_9 = arith.constant 1 : i32
      %7 = arith.muli %arg6, %c1_i32_9 : i32
      %c0_i32_10 = arith.constant 0 : i32
      %8 = arith.addi %c0_i32_10, %7 : i32
      %c0_i32_11 = arith.constant 0 : i32
      %c0_i32_12 = arith.constant 0 : i32
      %9 = tpu.memref_slice %arg2[%c0_i32_11, %c0_i32_12] : memref<64x32xf32, #tpu.memory_space<any>> -> memref<1x32xf32, #tpu.memory_space<any>>
      %10 = tpu.memref_squeeze %9 : memref<1x32xf32, #tpu.memory_space<any>> -> memref<32xf32, #tpu.memory_space<any>>
      %c0_i32_13 = arith.constant 0 : i32
      %11 = tpu.memref_slice %arg4[%8, %c0_i32_13] : memref<16x32xf32, #tpu.memory_space<vmem>> -> memref<1x32xf32, #tpu.memory_space<vmem>>
      %12 = tpu.memref_squeeze %11 : memref<1x32xf32, #tpu.memory_space<vmem>> -> memref<32xf32, #tpu.memory_space<vmem>>
      tpu.wait_dma2 semaphore(%arg5 : memref<!tpu.dma_semaphore, #tpu.memory_space<semaphore_mem>>) src(%10 : memref<32xf32, #tpu.memory_space<any>>) dst(%12 : memref<32xf32, #tpu.memory_space<vmem>>)
    }
    %c16_i32_5 = arith.constant 16 : i32
    %c0 = arith.constant 0 : index
    %c0_6 = arith.constant 0 : index
    %3 = vector.load %arg4[%c0, %c0_6] : memref<16x32xf32, #tpu.memory_space<vmem>>, vector<16x32xf32>
    %cst = arith.constant 5.65685415 : f32
    %4 = vector.broadcast %cst : f32 to vector<16x32xf32>
    %5 = arith.mulf %3, %4 : vector<16x32xf32>
    %c0_7 = arith.constant 0 : index
    %c0_8 = arith.constant 0 : index
    %6 = vector.load %arg3[%c0_7, %c0_8] : memref<16x32xf32, #tpu.memory_space<vmem>>, vector<16x32xf32>
    tpu.vector_store %arg3[%c0_7, %c0_8], %5 {strides = array<i32>} : memref<16x32xf32, #tpu.memory_space<vmem>>, vector<16x32xf32>,
    return
  }
  func.func @transform_1(%arg0: i32, %arg1: memref<16xi32, #tpu.memory_space<smem>>) -> (i32, i32) {
    %c0_i32 = arith.constant 0 : i32
    %c0_i32_0 = arith.constant 0 : i32
    return %arg0, %c0_i32 : i32, i32
  }
}

</mosaic_0001>

<bundles_post_ra>
// kernel: tpu_custom_call.1
= control target key start
LH: loop header
LB: loop body
LE: loop exit
PB: predicated region body
PF: predicated region fallthrough
CT: control target
= control target key end

     0   :  { %s195_s12 = smov [#allocation5]   ;;  %s223_s0 = inlined_call_operand.vmem [shape: s32[16], index: 0, kind: input, shape index: {}]   ;;  %s224_s1 = inlined_call_operand.vmem [shape: f32[64,32], index: 1, kind: input, shape index: {}]   ;;  %s225_s2 = inlined_call_operand.hbm [shape: f32[16,32], index: 2, kind: output, shape index: {}]  }
   0x1   :  { %s8_s11 = sshll.u32 %s223_s0, 4  ;;  %s9_s11 = int_to_ptr.vmem [resolvable:$true] %s8_s11 }
   0x2   :  { %11 = dma.vmem_to_smem %s9_s11, 16, %s195_s12, [#allocation4] }
   0x3   :  { %181 = dma.done.wait [#allocation4], 16 }
   0x4   :  { %182 = vsyncadd [#allocation4], 4294967280 }
   0x5   :  { %14 = sfence }
   0x6   :  { %15 = vsyncpa [#allocation7], 0  ;;  %s187_s13 = smov 0  }
   0x7 LB: > { %s24_s14 = sld [smem:[#allocation5 + %s189_s13]]  ;;  %s26_s18 = scalar_lea.vmem [#allocation2], %s189_s13  ;;  %s189_s13 = sphi %s187_s13, %s22_s13  }
   0xd   : > { %s25_s17 = scalar_lea.vmem %s224_s1, %s24_s14 }
   0xe   : > { %v41_v0 = vld [vmem:[%s25_s17] sm:$0x1] }
   0xf   : > { %42 = vst [vmem:[%s26_s18] sm:$0x1] %v41_v0 }
  0x10   : > { %60 = vsyncadd [#allocation3], 16  ;;  %s22_s13 = sadd.s32 1, %s189_s13  }
  0x11   : > { %p19_p0 = scmp.ge.s32.totalorder %s22_s13, 16  }
  0x12   :  { %s191_s0 = smov (%p19_p0), 0  }
  0x13   :  { %21 = sbr.rel (!%p19_p0) target bundleno = 7 (0x7), region = 70 }
  0x18 LB: > { %183 = dma.done.wait [#allocation3], 16  ;;  %s193_s0 = sphi %s191_s0, %s66_s0  }
  0x19   : > { %184 = vsyncadd [#allocation3], 4294967280  ;;  %s66_s0 = sadd.s32 1, %s193_s0  }
  0x1a   : > { %p63_p1 = scmp.ge.s32.totalorder %s66_s0, 16  }
  0x1b   :  { %v69_v1 = vld [vmem:[#allocation2] sm:$0xff] (%p63_p1)  ;;  %vm73_vm0 = vcmask (%p63_p1), 261120   ;;  %v70_v2 = vld [vmem:[#allocation2 + $0x8] sm:$0xff] (%p63_p1)  ;;  %s82_s21 = sshll.u32 (%p63_p1), %s225_s2, 4  ;;  %s196_s22 = smov (%p63_p1), [#allocation6]   ;;  %s83_s21 = int_to_ptr.hbm [resolvable:$true] %s82_s21 }
  0x1c   :  { %65 = sbr.rel (!%p63_p1) target bundleno = 24 (0x18), region = 81  ;;  %v71_v3 = vmul.f32 (%p63_p1), 5.656854, %v69_v1  ;;  %v72_v4 = vmul.f32 (%p63_p1), 5.656854, %v70_v2  ;;  %s80_s1 = sshll.u32 (%p63_p1), %s196_s22, 4  ;;  %s81_s1 = int_to_ptr.vmem [resolvable:$true] %s80_s1 }
  0x1d   :  { %s197_s23 = smov (%p63_p1), 128   ;;  %s198_s24 = smov (%p63_p1), 8  }
  0x1e   :  { %74 = vst.msk [vmem:[#allocation6] sm:$0xff] (%p63_p1), %vm73_vm0, %v71_v3 }
  0x1f   :  { %75 = vst.msk [vmem:[#allocation6 + $0x8] sm:$0xff] (%p63_p1), %vm73_vm0, %v72_v4 }
  0x20   :  { %88 = dma.vmem_to_hbm [thread:$0]  (%p63_p1), %s81_s1, 256, %s83_s21, [#allocation7], %s197_s23, %s197_s23, %s198_s24  }
  0x21   :  { %185 = dma.done.wait [#allocation7], 256  }
  0x22   :  { %186 = vsyncadd [#allocation7], 4294967040 }
  0x23   :  { %93 = vsyncpa [#allocation7], 1 }
  0x24   :  { %94 = vsyncmov [#allocation3] }
  0x27   :  { %s95_s25 = vpop.sfrf %94 }
  0x28   :  { %p116_p2 = scmp.ne.s32.totalorder %s95_s25, 0 }
  0x2a   :  { %99 = shalt.err (%p116_p2)  }

</bundles_post_ra>
